<compile_context>
chip_gen: v5e
topology: v5e:2x2
jax: 0.10.0
libtpu: 0.0.40
codegen_flags: <defaults>
</compile_context>

<pallas_src>
import jax
import jax.numpy as jnp
from jax.experimental import pallas as pl
from jax.experimental.pallas import tpu as pltpu

# ---------------- problem sizes (small, consistent with the module) ----------------
NUM_HOPS = 3     # num_hops
NFEAT    = 32    # nfeat
HIDDEN   = 32    # hidden
NCLASS   = 16    # nclass
N_NODES  = 256   # number of graph nodes (lane dimension inside the kernel; multiple of 128)

# ---------------- packed-weight layout (single f32 VMEM operand, 128 lanes) ----------
# Section starts are 8-row aligned; weight blocks are cast to bf16 inside the kernel,
# biases / PReLU alphas (dedicated lanes) stay f32.
ROW_PR     = 0                       # rows [0 : 2K)    : batched attention projection
                                     #   row k      lanes [k*F:(k+1)*F] = wa_l  -> p_k
                                     #   row K+k    lanes [k*F:(k+1)*F] = wa_r  -> r_k (+ b_att)
ROW_W1     = 8                       # rows [8 : 8+H)   : lr_output layer-1 weight  (w1.T)
ROW_WL1    = ROW_W1 + HIDDEN         # rows [40: 40+H)  : label_fc  layer-1 weight  (wl1.T)
ROW_W2     = ROW_WL1 + HIDDEN        # rows [72: 72+C)  : lr_output layer-2 weight  (w2.T)
ROW_WL2    = ROW_W2 + NCLASS         # rows [88: 88+C)  : label_fc  layer-2 weight  (wl2.T)
PK_ROWS    = ROW_WL2 + NCLASS        # 104 (multiple of 8)
PK_LANES   = 128
LANE_BIAS  = 120                     # bias column of each section
LANE_ALPHA = 121                     # per-row PReLU alpha column (layer-1 sections only)


# --------------------------------- Pallas kernel -----------------------------------
def r_gamlp_rlu_kernel(feats_ref, label_ref, wpk_ref, out_ref):
    K  = feats_ref.shape[0]
    F  = feats_ref.shape[1]
    Nt = feats_ref.shape[2]
    C  = label_ref.shape[0]
    H  = HIDDEN

    # ---- unpack packed weights (static slices; weight blocks -> bf16 MXU operands) ----
    w_pr = wpk_ref[ROW_PR:ROW_PR + 2 * K, 0:K * F].astype(jnp.bfloat16)      # [2K, K*F]
    b_pr = wpk_ref[ROW_PR:ROW_PR + 2 * K, LANE_BIAS:LANE_BIAS + 1]           # [2K, 1]  (0 for p rows, b_att for r rows)
    w1   = wpk_ref[ROW_W1:ROW_W1 + H, 0:F].astype(jnp.bfloat16)              # [H, F]
    b1   = wpk_ref[ROW_W1:ROW_W1 + H, LANE_BIAS:LANE_BIAS + 1]               # [H, 1]
    a1   = wpk_ref[ROW_W1:ROW_W1 + H, LANE_ALPHA:LANE_ALPHA + 1]             # [H, 1]
    wl1  = wpk_ref[ROW_WL1:ROW_WL1 + H, 0:C].astype(jnp.bfloat16)            # [H, C]
    bl1  = wpk_ref[ROW_WL1:ROW_WL1 + H, LANE_BIAS:LANE_BIAS + 1]             # [H, 1]
    al1  = wpk_ref[ROW_WL1:ROW_WL1 + H, LANE_ALPHA:LANE_ALPHA + 1]           # [H, 1]
    w2   = wpk_ref[ROW_W2:ROW_W2 + C, 0:H].astype(jnp.bfloat16)              # [C, H]
    b2   = wpk_ref[ROW_W2:ROW_W2 + C, LANE_BIAS:LANE_BIAS + 1]               # [C, 1]
    wl2  = wpk_ref[ROW_WL2:ROW_WL2 + C, 0:H].astype(jnp.bfloat16)            # [C, H]
    bl2  = wpk_ref[ROW_WL2:ROW_WL2 + C, LANE_BIAS:LANE_BIAS + 1]             # [C, 1]

    # ---- label branch (independent of the attention recursion -> issues early and
    #      hides under the serial chain; the MXU is otherwise idle) ----
    hl = jnp.dot(wl1, label_ref[...], preferred_element_type=jnp.float32) + bl1          # [H, Nt]
    hl = jnp.where(hl >= 0.0, hl, al1 * hl)                                              # PReLU
    out_label = jnp.dot(wl2, hl.astype(jnp.bfloat16),
                        preferred_element_type=jnp.float32) + bl2                        # [C, Nt]

    # ---- batched attention projections (single matmul, no concat copy):
    #      p_k = wa_l . feats[k],  r_k = wa_r . feats[k] + b_att ----
    feats_all = feats_ref[...].reshape(K * F, Nt)                                        # [K*F, Nt] bf16 (free reshape)
    pr = jnp.dot(w_pr, feats_all, preferred_element_type=jnp.float32) + b_pr             # [2K, Nt] f32
    p = [pr[k:k + 1, :] for k in range(K)]
    r = [pr[K + k:K + k + 1, :] for k in range(K)]

    # ---- hop recursion on [1, Nt] rows only (pure VPU/EUP; no MXU, no feature mixes).
    #      By linearity:  wa_l . history_i = sum_{j<i} softmax_j * p_j.
    #      Scores are sigmoid outputs in (0,1) -> exp needs no running-max stabilisation
    #      (restore the max if the activation ever changes), each exp(score) is computed
    #      exactly once, and the normalisation uses an exact reciprocal. ----
    s0 = jax.nn.sigmoid(p[0] + r[0])
    e = [jnp.exp(s0)]
    run_e  = e[0]                 # sum_{j} exp(s_j)
    run_ep = e[0] * p[0]          # sum_{j} exp(s_j) * p_j
    for i in range(1, K):
        hist_p = run_ep * (1.0 / run_e)                       # softmax-weighted wa_l.history
        s_i = jax.nn.sigmoid(hist_p + r[i])
        e_i = jnp.exp(s_i)
        e.append(e_i)
        run_e  = run_e + e_i
        run_ep = run_ep + e_i * p[i]

    # ---- final attention-weighted feature mix (the only full [F, Nt] attention work) ----
    inv = 1.0 / run_e
    right = feats_all[0:F, :] * (e[0] * inv)
    for k in range(1, K):
        right = right + feats_all[k * F:(k + 1) * F, :] * (e[k] * inv)                   # [F, Nt] f32

    # ---- lr_output: Dense -> PReLU -> Dense ----
    h = jnp.dot(w1, right.astype(jnp.bfloat16), preferred_element_type=jnp.float32) + b1  # [H, Nt]
    h = jnp.where(h >= 0.0, h, a1 * h)                                                    # PReLU
    out_main = jnp.dot(w2, h.astype(jnp.bfloat16), preferred_element_type=jnp.float32) + b2

    out_ref[...] = (out_main + out_label).astype(out_ref.dtype)                           # full-lane vst


# ------------------------------ weight packing (wrapper) -----------------------------
def _pack_weights(params, K, F, H, C):
    (w_att, b_att, w1, b1, a1, w2, b2, wl1, bl1, al, wl2, bl2) = params
    assert 2 * K <= ROW_W1 and K * F <= LANE_BIAS and max(F, H, C) <= LANE_BIAS
    assert PK_LANES == 128 and PK_ROWS % 8 == 0
    wa_l = w_att[:F, 0]          # applied to `history`
    wa_r = w_att[F:, 0]          # applied to x_i

    wpk = jnp.zeros((PK_ROWS, PK_LANES), jnp.float32)
    # section A: batched attention projection (block-diagonal wa_l rows, then wa_r rows)
    for k in range(K):
        wpk = wpk.at[ROW_PR + k,     k * F:(k + 1) * F].set(wa_l)
        wpk = wpk.at[ROW_PR + K + k, k * F:(k + 1) * F].set(wa_r)
    wpk = wpk.at[ROW_PR + K:ROW_PR + 2 * K, LANE_BIAS].set(b_att[0, 0])
    # section B: lr_output layer 1 (w1.T) + bias + PReLU alpha
    wpk = wpk.at[ROW_W1:ROW_W1 + H, 0:F].set(w1.T)
    wpk = wpk.at[ROW_W1:ROW_W1 + H, LANE_BIAS].set(b1[0])
    wpk = wpk.at[ROW_W1:ROW_W1 + H, LANE_ALPHA].set(a1[0, 0])
    # section C: label_fc layer 1 (wl1.T) + bias + PReLU alpha
    wpk = wpk.at[ROW_WL1:ROW_WL1 + H, 0:C].set(wl1.T)
    wpk = wpk.at[ROW_WL1:ROW_WL1 + H, LANE_BIAS].set(bl1[0])
    wpk = wpk.at[ROW_WL1:ROW_WL1 + H, LANE_ALPHA].set(al[0, 0])
    # section D: lr_output layer 2 (w2.T) + bias
    wpk = wpk.at[ROW_W2:ROW_W2 + C, 0:H].set(w2.T)
    wpk = wpk.at[ROW_W2:ROW_W2 + C, LANE_BIAS].set(b2[0])
    # section E: label_fc layer 2 (wl2.T) + bias
    wpk = wpk.at[ROW_WL2:ROW_WL2 + C, 0:H].set(wl2.T)
    wpk = wpk.at[ROW_WL2:ROW_WL2 + C, LANE_BIAS].set(bl2[0])
    return wpk


def _choose_tile_n(n):
    # The kernel is latency/overhead-bound at small N: use ONE grid step (each extra step
    # costs ~0.35us and the serial attention chain does not shrink with lane count), and do
    # not split the node axis across v7x's two TensorCores at these sizes.
    # For large N, cap the tile so the BlockSpec auto-pipeline overlaps HBM DMA with compute;
    # per-lane footprint is only ~300 B double-buffered, so 1024-lane tiles sit far inside the
    # scoped-VMEM budget of every generation (v5e 16 MiB, v6e 32 MiB, v7x 32/64 MiB).
    TILE_CAP = 1024
    assert n % 128 == 0, "node count must be a multiple of 128 (lane-dense layout)"
    if n <= TILE_CAP:
        return n
    t = TILE_CAP
    while t >= 128:
        if n % t == 0:
            return t
        t -= 128
    return 128


# ------------------------------------ wrapper ---------------------------------------
def r_gamlp_rlu_forward(feats, label_emb, params):
    """feats: [K, N, F] float32 (module layout), label_emb: [N, C] float32. Returns [N, C] float32."""
    K, N, F = feats.shape
    C = label_emb.shape[1]

    # Lane-dense (node-last) layout + bf16 MXU operands; layout plumbing stays in the wrapper.
    # NOTE: at scale, produce feats node-last upstream instead of transposing here (each
    # transpose is an extra HBM read+write in XLA); negligible at N=256.
    feats_t = jnp.transpose(feats, (0, 2, 1)).astype(jnp.bfloat16)   # [K, F, N]
    label_t = label_emb.T.astype(jnp.bfloat16)                       # [C, N]
    wpk = _pack_weights(params, K, F, HIDDEN, C)                     # single packed f32 weight operand

    tile_n = _choose_tile_n(N)
    assert N % tile_n == 0
    grid = (N // tile_n,)

    out_t = pl.pallas_call(
        r_gamlp_rlu_kernel,
        out_shape=jax.ShapeDtypeStruct((C, N), jnp.float32),
        grid=grid,
        in_specs=[
            pl.BlockSpec((K, F, tile_n), lambda i: (0, 0, i)),    # feats tile (node-last, bf16)
            pl.BlockSpec((C, tile_n), lambda i: (0, i)),          # label tile (node-last, bf16)
            pl.BlockSpec((PK_ROWS, PK_LANES), lambda i: (0, 0)),  # packed weights (f32)
        ],
        out_specs=pl.BlockSpec((C, tile_n), lambda i: (0, i)),
        compiler_params=pltpu.CompilerParams(dimension_semantics=("parallel",)),
    )(feats_t, label_t, wpk)
    return out_t.T                                                   # back to module layout [N, C]


# ------------------------------ pure-JAX reference -----------------------------------
def _prelu(x, a):
    return jnp.where(x >= 0, x, a * x)


def r_gamlp_rlu_ref(feats, label_emb, params):
    (w_att, b_att, w1, b1, a1, w2, b2, wl1, bl1, al, wl2, bl2) = params
    K, N, F = feats.shape
    wa_l, wa_r, ba = w_att[:F, :], w_att[F:, :], b_att[0, 0]

    def lr_att(h, xi):
        return jax.nn.sigmoid(h @ wa_l + xi @ wa_r + ba)

    f0 = feats[0]
    scores = [lr_att(f0, f0)]
    for i in range(1, K):
        att = jax.nn.softmax(jnp.concatenate(scores[:i], axis=1), axis=1)
        history = f0 * att[:, 0:1]
        for j in range(1, i):
            history = history + feats[j] * att[:, j:j + 1]
        scores.append(lr_att(history, feats[i]))
    att_final = jax.nn.softmax(jnp.concatenate(scores, axis=1), axis=1)
    right = f0 * att_final[:, 0:1]
    for i in range(1, K):
        right = right + feats[i] * att_final[:, i:i + 1]

    h = _prelu(right @ w1 + b1, a1[0, 0])
    out_main = h @ w2 + b2
    hl = _prelu(label_emb @ wl1 + bl1, al[0, 0])
    out_label = hl @ wl2 + bl2
    return out_main + out_label


# ------------------------------------- main -----------------------------------------
def _xavier_uniform(key, shape, gain=1.0):
    fan_in, fan_out = shape[0], shape[1]
    bound = gain * jnp.sqrt(6.0 / (fan_in + fan_out))
    return jax.random.uniform(key, shape, jnp.float32, -bound, bound)


if __name__ == "__main__":
    key = jax.random.PRNGKey(0)
    ks = jax.random.split(key, 10)
    relu_gain = jnp.sqrt(2.0)

    # inputs (module layout: hop-major list stacked, node-first)
    feats = jax.random.normal(ks[0], (NUM_HOPS, N_NODES, NFEAT), jnp.float32)
    label_emb = jax.random.normal(ks[1], (N_NODES, NCLASS), jnp.float32)

    # parameters (deterministic, shapes implied by __init__ with pre_process=False)
    w_att = _xavier_uniform(ks[2], (2 * NFEAT, 1), relu_gain)       # lr_att
    b_att = jnp.zeros((1, 1), jnp.float32)
    # lr_output (FeedForwardNetII, n_layers_2=2: Dense -> PReLU -> Dense)
    w1 = _xavier_uniform(ks[3], (NFEAT, HIDDEN), relu_gain)
    b1 = jnp.zeros((1, HIDDEN), jnp.float32)
    a1 = jnp.full((1, 1), 0.25, jnp.float32)                        # PReLU init
    w2 = _xavier_uniform(ks[4], (HIDDEN, NCLASS), relu_gain)
    b2 = jnp.zeros((1, NCLASS), jnp.float32)
    # label_fc (FeedForwardNet, n_layers_3=2: Linear -> PReLU -> Linear)
    wl1 = _xavier_uniform(ks[5], (NCLASS, HIDDEN), relu_gain)
    bl1 = jnp.zeros((1, HIDDEN), jnp.float32)
    al = jnp.full((1, 1), 0.25, jnp.float32)                        # PReLU init
    wl2 = _xavier_uniform(ks[6], (HIDDEN, NCLASS), relu_gain)
    bl2 = jnp.zeros((1, NCLASS), jnp.float32)

    params = (w_att, b_att, w1, b1, a1, w2, b2, wl1, bl1, al, wl2, bl2)

    fwd = jax.jit(r_gamlp_rlu_forward)
    out = fwd(feats, label_emb, params)
    out = jax.block_until_ready(out)

    ref = r_gamlp_rlu_ref(feats, label_emb, params)
    assert out.shape == (N_NODES, NCLASS)
    # Tolerance: the kernel uses bf16 MXU operands (~2^-9 relative rounding) through two stacked
    # 32-wide contractions plus the attention chain; at |out| ~ O(1..5) this gives worst-case
    # absolute deviations of a few 1e-2 vs the pure-f32 reference.  The softmax normalisation
    # itself is now exact (the previous approx reciprocal was removed per review).
    assert jnp.allclose(out, ref, atol=5e-2, rtol=5e-2), "mismatch vs JAX reference"

    print("KERNEL_OK")
</pallas_src>

<mosaic_0001>
module attributes {stable_mosaic.version = 11 : i64} {
  func.func @r_gamlp_rlu_kernel(%arg0: i32, %arg1: memref<3x32x256xbf16, #tpu.memory_space<vmem>>, %arg2: memref<16x256xbf16, #tpu.memory_space<vmem>>, %arg3: memref<104x128xf32, #tpu.memory_space<vmem>>, %arg4: memref<16x256xf32, #tpu.memory_space<vmem>>) attributes {dimension_semantics = [#tpu.dimension_semantics<parallel>], iteration_bounds = array<i64: 1>, scalar_prefetch = 0 : i64, scratch_operands = 0 : i64, tpu.core_type = #tpu.core_type<tc>, window_params = [{transform_indices = @transform_0, window_bounds = array<i64: 3, 32, 256>}, {transform_indices = @transform_1, window_bounds = array<i64: 16, 256>}, {pipeline_mode = #tpu.pipeline_mode<synchronous>, transform_indices = @transform_2, window_bounds = array<i64: 104, 128>}, {transform_indices = @transform_3, window_bounds = array<i64: 16, 256>}]} {
    %c0 = arith.constant 0 : index
    %c0_0 = arith.constant 0 : index
    %0 = vector.load %arg3[%c0, %c0_0] : memref<104x128xf32, #tpu.memory_space<vmem>>, vector<6x96xf32>
    %1 = arith.truncf %0 : vector<6x96xf32> to vector<6x96xbf16>
    %c0_1 = arith.constant 0 : index
    %c120 = arith.constant 120 : index
    %2 = vector.load %arg3[%c0_1, %c120] : memref<104x128xf32, #tpu.memory_space<vmem>>, vector<6x1xf32>
    %c8 = arith.constant 8 : index
    %c0_2 = arith.constant 0 : index
    %3 = vector.load %arg3[%c8, %c0_2] : memref<104x128xf32, #tpu.memory_space<vmem>>, vector<32x32xf32>
    %4 = arith.truncf %3 : vector<32x32xf32> to vector<32x32xbf16>
    %c8_3 = arith.constant 8 : index
    %c120_4 = arith.constant 120 : index
    %5 = vector.load %arg3[%c8_3, %c120_4] : memref<104x128xf32, #tpu.memory_space<vmem>>, vector<32x1xf32>
    %c8_5 = arith.constant 8 : index
    %c121 = arith.constant 121 : index
    %6 = vector.load %arg3[%c8_5, %c121] : memref<104x128xf32, #tpu.memory_space<vmem>>, vector<32x1xf32>
    %c40 = arith.constant 40 : index
    %c0_6 = arith.constant 0 : index
    %7 = vector.load %arg3[%c40, %c0_6] : memref<104x128xf32, #tpu.memory_space<vmem>>, vector<32x16xf32>
    %8 = arith.truncf %7 : vector<32x16xf32> to vector<32x16xbf16>
    %c40_7 = arith.constant 40 : index
    %c120_8 = arith.constant 120 : index
    %9 = vector.load %arg3[%c40_7, %c120_8] : memref<104x128xf32, #tpu.memory_space<vmem>>, vector<32x1xf32>
    %c40_9 = arith.constant 40 : index
    %c121_10 = arith.constant 121 : index
    %10 = vector.load %arg3[%c40_9, %c121_10] : memref<104x128xf32, #tpu.memory_space<vmem>>, vector<32x1xf32>
    %c72 = arith.constant 72 : index
    %c0_11 = arith.constant 0 : index
    %11 = vector.load %arg3[%c72, %c0_11] : memref<104x128xf32, #tpu.memory_space<vmem>>, vector<16x32xf32>
    %12 = arith.truncf %11 : vector<16x32xf32> to vector<16x32xbf16>
    %c72_12 = arith.constant 72 : index
    %c120_13 = arith.constant 120 : index
    %13 = vector.load %arg3[%c72_12, %c120_13] : memref<104x128xf32, #tpu.memory_space<vmem>>, vector<16x1xf32>
    %c88 = arith.constant 88 : index
    %c0_14 = arith.constant 0 : index
    %14 = vector.load %arg3[%c88, %c0_14] : memref<104x128xf32, #tpu.memory_space<vmem>>, vector<16x32xf32>
    %15 = arith.truncf %14 : vector<16x32xf32> to vector<16x32xbf16>
    %c88_15 = arith.constant 88 : index
    %c120_16 = arith.constant 120 : index
    %16 = vector.load %arg3[%c88_15, %c120_16] : memref<104x128xf32, #tpu.memory_space<vmem>>, vector<16x1xf32>
    %c0_17 = arith.constant 0 : index
    %c0_18 = arith.constant 0 : index
    %17 = vector.load %arg2[%c0_17, %c0_18] : memref<16x256xbf16, #tpu.memory_space<vmem>>, vector<16x256xbf16>
    %cst = arith.constant dense<0.000000e+00> : vector<32x256xf32>
    %18 = tpu.matmul %8, %17, %cst {dimension_numbers = #tpu.dot_dimension_numbers<[1], [0], [0], [1], [0, 0, 1, 1], [], []>} : vector<32x16xbf16>, vector<16x256xbf16>, vector<32x256xf32> -> vector<32x256xf32>
    %19 = vector.broadcast %9 : vector<32x1xf32> to vector<32x256xf32>
    %20 = arith.addf %18, %19 : vector<32x256xf32>
    %cst_19 = arith.constant 0.000000e+00 : f32
    %21 = vector.broadcast %cst_19 : f32 to vector<32x256xf32>
    %22 = arith.cmpf oge, %20, %21 : vector<32x256xf32>
    %23 = vector.broadcast %10 : vector<32x1xf32> to vector<32x256xf32>
    %24 = arith.mulf %23, %20 : vector<32x256xf32>
    %25 = arith.select %22, %20, %24 : vector<32x256xi1>, vector<32x256xf32>
    %26 = arith.truncf %25 : vector<32x256xf32> to vector<32x256xbf16>
    %cst_20 = arith.constant dense<0.000000e+00> : vector<16x256xf32>
    %27 = tpu.matmul %15, %26, %cst_20 {dimension_numbers = #tpu.dot_dimension_numbers<[1], [0], [0], [1], [0, 0, 1, 1], [], []>} : vector<16x32xbf16>, vector<32x256xbf16>, vector<16x256xf32> -> vector<16x256xf32>
    %28 = vector.broadcast %16 : vector<16x1xf32> to vector<16x256xf32>
    %29 = arith.addf %27, %28 : vector<16x256xf32>
    %c0_21 = arith.constant 0 : index
    %c0_22 = arith.constant 0 : index
    %c0_23 = arith.constant 0 : index
    %30 = vector.load %arg1[%c0_21, %c0_22, %c0_23] : memref<3x32x256xbf16, #tpu.memory_space<vmem>>, vector<3x32x256xbf16>
    %31 = vector.shape_cast %30 : vector<3x32x256xbf16> to vector<96x256xbf16>
    %cst_24 = arith.constant dense<0.000000e+00> : vector<6x256xf32>
    %32 = tpu.matmul %1, %31, %cst_24 {dimension_numbers = #tpu.dot_dimension_numbers<[1], [0], [0], [1], [0, 0, 1, 1], [], []>} : vector<6x96xbf16>, vector<96x256xbf16>, vector<6x256xf32> -> vector<6x256xf32>
    %33 = vector.broadcast %2 : vector<6x1xf32> to vector<6x256xf32>
    %34 = arith.addf %32, %33 : vector<6x256xf32>
    %35 = vector.extract_strided_slice %34 {offsets = [0, 0], sizes = [1, 256], strides = [1, 1]} : vector<6x256xf32> to vector<1x256xf32>
    %36 = vector.extract_strided_slice %34 {offsets = [1, 0], sizes = [1, 256], strides = [1, 1]} : vector<6x256xf32> to vector<1x256xf32>
    %37 = vector.extract_strided_slice %34 {offsets = [3, 0], sizes = [1, 256], strides = [1, 1]} : vector<6x256xf32> to vector<1x256xf32>
    %38 = vector.extract_strided_slice %34 {offsets = [4, 0], sizes = [1, 256], strides = [1, 1]} : vector<6x256xf32> to vector<1x256xf32>
    %39 = vector.extract_strided_slice %34 {offsets = [5, 0], sizes = [1, 256], strides = [1, 1]} : vector<6x256xf32> to vector<1x256xf32>
    %40 = arith.addf %35, %37 : vector<1x256xf32>
    %41 = arith.negf %40 : vector<1x256xf32>
    %42 = math.exp %41 : vector<1x256xf32>
    %cst_25 = arith.constant 1.000000e+00 : f32
    %43 = vector.broadcast %cst_25 : f32 to vector<1x256xf32>
    %44 = arith.addf %43, %42 : vector<1x256xf32>
    %45 = arith.divf %43, %44 : vector<1x256xf32>
    %46 = math.exp %45 : vector<1x256xf32>
    %47 = arith.mulf %46, %35 : vector<1x256xf32>
    %cst_26 = arith.constant 1.000000e+00 : f32
    %48 = vector.broadcast %cst_26 : f32 to vector<1x256xf32>
    %49 = arith.divf %48, %46 : vector<1x256xf32>
    %50 = arith.mulf %47, %49 : vector<1x256xf32>
    %51 = arith.addf %50, %38 : vector<1x256xf32>
    %52 = arith.negf %51 : vector<1x256xf32>
    %53 = math.exp %52 : vector<1x256xf32>
    %cst_27 = arith.constant 1.000000e+00 : f32
    %54 = vector.broadcast %cst_27 : f32 to vector<1x256xf32>
    %55 = arith.addf %54, %53 : vector<1x256xf32>
    %56 = arith.divf %54, %55 : vector<1x256xf32>
    %57 = math.exp %56 : vector<1x256xf32>
    %58 = arith.addf %46, %57 : vector<1x256xf32>
    %59 = arith.mulf %57, %36 : vector<1x256xf32>
    %60 = arith.addf %47, %59 : vector<1x256xf32>
    %cst_28 = arith.constant 1.000000e+00 : f32
    %61 = vector.broadcast %cst_28 : f32 to vector<1x256xf32>
    %62 = arith.divf %61, %58 : vector<1x256xf32>
    %63 = arith.mulf %60, %62 : vector<1x256xf32>
    %64 = arith.addf %63, %39 : vector<1x256xf32>
    %65 = arith.negf %64 : vector<1x256xf32>
    %66 = math.exp %65 : vector<1x256xf32>
    %cst_29 = arith.constant 1.000000e+00 : f32
    %67 = vector.broadcast %cst_29 : f32 to vector<1x256xf32>
    %68 = arith.addf %67, %66 : vector<1x256xf32>
    %69 = arith.divf %67, %68 : vector<1x256xf32>
    %70 = math.exp %69 : vector<1x256xf32>
    %71 = arith.addf %58, %70 : vector<1x256xf32>
    %cst_30 = arith.constant 1.000000e+00 : f32
    %72 = vector.broadcast %cst_30 : f32 to vector<1x256xf32>
    %73 = arith.divf %72, %71 : vector<1x256xf32>
    %74 = vector.extract_strided_slice %31 {offsets = [0, 0], sizes = [32, 256], strides = [1, 1]} : vector<96x256xbf16> to vector<32x256xbf16>
    %75 = arith.mulf %46, %73 : vector<1x256xf32>
    %76 = arith.extf %74 : vector<32x256xbf16> to vector<32x256xf32>
    %77 = vector.broadcast %75 : vector<1x256xf32> to vector<32x256xf32>
    %78 = arith.mulf %76, %77 : vector<32x256xf32>
    %79 = vector.extract_strided_slice %31 {offsets = [32, 0], sizes = [32, 256], strides = [1, 1]} : vector<96x256xbf16> to vector<32x256xbf16>
    %80 = arith.mulf %57, %73 : vector<1x256xf32>
    %81 = arith.extf %79 : vector<32x256xbf16> to vector<32x256xf32>
    %82 = vector.broadcast %80 : vector<1x256xf32> to vector<32x256xf32>
    %83 = arith.mulf %81, %82 : vector<32x256xf32>
    %84 = arith.addf %78, %83 : vector<32x256xf32>
    %85 = vector.extract_strided_slice %31 {offsets = [64, 0], sizes = [32, 256], strides = [1, 1]} : vector<96x256xbf16> to vector<32x256xbf16>
    %86 = arith.mulf %70, %73 : vector<1x256xf32>
    %87 = arith.extf %85 : vector<32x256xbf16> to vector<32x256xf32>
    %88 = vector.broadcast %86 : vector<1x256xf32> to vector<32x256xf32>
    %89 = arith.mulf %87, %88 : vector<32x256xf32>
    %90 = arith.addf %84, %89 : vector<32x256xf32>
    %91 = arith.truncf %90 : vector<32x256xf32> to vector<32x256xbf16>
    %cst_31 = arith.constant dense<0.000000e+00> : vector<32x256xf32>
    %92 = tpu.matmul %4, %91, %cst_31 {dimension_numbers = #tpu.dot_dimension_numbers<[1], [0], [0], [1], [0, 0, 1, 1], [], []>} : vector<32x32xbf16>, vector<32x256xbf16>, vector<32x256xf32> -> vector<32x256xf32>
    %93 = vector.broadcast %5 : vector<32x1xf32> to vector<32x256xf32>
    %94 = arith.addf %92, %93 : vector<32x256xf32>
    %cst_32 = arith.constant 0.000000e+00 : f32
    %95 = vector.broadcast %cst_32 : f32 to vector<32x256xf32>
    %96 = arith.cmpf oge, %94, %95 : vector<32x256xf32>
    %97 = vector.broadcast %6 : vector<32x1xf32> to vector<32x256xf32>
    %98 = arith.mulf %97, %94 : vector<32x256xf32>
    %99 = arith.select %96, %94, %98 : vector<32x256xi1>, vector<32x256xf32>
    %100 = arith.truncf %99 : vector<32x256xf32> to vector<32x256xbf16>
    %cst_33 = arith.constant dense<0.000000e+00> : vector<16x256xf32>
    %101 = tpu.matmul %12, %100, %cst_33 {dimension_numbers = #tpu.dot_dimension_numbers<[1], [0], [0], [1], [0, 0, 1, 1], [], []>} : vector<16x32xbf16>, vector<32x256xbf16>, vector<16x256xf32> -> vector<16x256xf32>
    %102 = vector.broadcast %13 : vector<16x1xf32> to vector<16x256xf32>
    %103 = arith.addf %101, %102 : vector<16x256xf32>
    %104 = arith.addf %103, %29 : vector<16x256xf32>
    %c0_34 = arith.constant 0 : index
    %c0_35 = arith.constant 0 : index
    %105 = vector.load %arg4[%c0_34, %c0_35] : memref<16x256xf32, #tpu.memory_space<vmem>>, vector<16x256xf32>
    tpu.vector_store %arg4[%c0_34, %c0_35], %104 {strides = array<i32>} : memref<16x256xf32, #tpu.memory_space<vmem>>, vector<16x256xf32>,
    return
  }
  func.func @transform_0(%arg0: i32) -> (i32, i32, i32) {
    %c0_i32 = arith.constant 0 : i32
    %c0_i32_0 = arith.constant 0 : i32
    %c0_i32_1 = arith.constant 0 : i32
    return %c0_i32, %c0_i32_0, %arg0 : i32, i32, i32
  }
  func.func @transform_1(%arg0: i32) -> (i32, i32) {
    %c0_i32 = arith.constant 0 : i32
    %c0_i32_0 = arith.constant 0 : i32
    return %c0_i32, %arg0 : i32, i32
  }
  func.func @transform_2(%arg0: i32) -> (i32, i32) {
    %c0_i32 = arith.constant 0 : i32
    %c0_i32_0 = arith.constant 0 : i32
    %c0_i32_1 = arith.constant 0 : i32
    return %c0_i32, %c0_i32_0 : i32, i32
  }
  func.func @transform_3(%arg0: i32) -> (i32, i32) {
    %c0_i32 = arith.constant 0 : i32
    %c0_i32_0 = arith.constant 0 : i32
    return %c0_i32, %arg0 : i32, i32
  }
}

</mosaic_0001>

<bundles_post_ra>
// kernel: r_gamlp_rlu_forward.1
= control target key start
LH: loop header
LB: loop body
LE: loop exit
PB: predicated region body
PF: predicated region fallthrough
CT: control target
= control target key end

     0   :  { %v994_v3 = vmov 120   ;;  %vm68_vm0 = vcmask 130048   ;;  %v995_v11 = vmov 121   ;;  %s1410_s0 = inlined_call_operand.vmem [shape: bf16[3,32,256], index: 0, kind: input, shape index: {}]   ;;  %s1411_s1 = inlined_call_operand.vmem [shape: bf16[16,256], index: 1, kind: input, shape index: {}]   ;;  %s1412_s2 = inlined_call_operand.vmem [shape: f32[104,128], index: 2, kind: input, shape index: {}]   ;;  %s1413_s3 = inlined_call_operand.hbm [shape: f32[16,256], index: 3, kind: output, shape index: {}]  }
   0x1   :  { %v26_v0 = vld [vmem:[%s1412_s2 + $0x38] sm:$0xff]  ;;  %v817_v1 = vld [vmem:[%s1411_s1] sm:$0xf]  ;;  %v892_v2 = vld [vmem:[%s1411_s1 + $0x4] sm:$0xf0]  ;;  %910 = vset.pattern.permute.xlu0 %v994_v3  ;;  %912 = vset.pattern.permute.xlu2 %v994_v3 }
   0x2   :  { %v818_v4 = vor.u32 %v892_v2, %v817_v1  ;;  %v891_v5 = vld [vmem:[%s1411_s1 + $0x4] sm:$0xf]  ;;  %v819_v6 = vld [vmem:[%s1411_s1 + $0x8] sm:$0xf0]  ;;  %50 = vperm.xlu0 %910, %v26_v0   ;;  %v25_v9 = vld [vmem:[%s1412_s2 + $0x30] sm:$0xff]  ;;  %911 = vset.pattern.permute.xlu1 %v995_v11 }
   0x3   :  { %v24_v7 = vld [vmem:[%s1412_s2 + $0x28] sm:$0xff]  ;;  %v822_v8 = vor.u32 %v891_v5, %v819_v6  ;;  %130 = vperm.xlu1 %911, %v26_v0  }
   0x4   :  { %40 = vperm.xlu2 %912, %v24_v7   ;;  %82 = vmatpush.bf16.msra.mxu0 %v818_v4  ;;  %v28_v10 = vpack.c.bf16 %v25_v9, %v24_v7 }
   0x5   :  { %101 = vmatpush.bf16.msra.mxu1 %v822_v8 }
   0x6   :  { %8 = vsyncpa [#allocation3], 0  ;;  %v27_v12 = vld [vmem:[%s1412_s2 + $0x40] sm:$0xff]  ;;  %v1063_v16 = vld [vmem:[%s1412_s2 + $0x18] sm:$0xff]  ;;  %vm167_vm9 = vcmask 261120   ;;  %vm276_vm10 = vcmask 785408  }
   0x7   :  { %823 = vmatmul.msk.bf16.vlgmr.msra.gmra.mxu0 %vm68_vm0, %v28_v10  ;;  %v1050_v13 = vld [vmem:[%s1412_s2] sm:$0x3f]  ;;  %v29_v14 = vpack.c.bf16 %v27_v12, %v26_v0  ;;  %v1072_v17 = vld [vmem:[%s1412_s2 + $0x8] sm:$0xff]  ;;  %v1082_v22 = vld [vmem:[%s1412_s2 + $0x58] sm:$0xff]  ;;  %s803_s8 = sshll.u32 %s1413_s3, 4  ;;  %s997_s9 = smov 256   ;;  %s804_s8 = int_to_ptr.hbm [resolvable:$true] %s803_s8 }
   0x8   :  { %825 = vmatmul.msk.bf16.vlgmr.msra.gmra.mxu1 %vm68_vm0, %v28_v10  ;;  %v1058_v15 = vld [vmem:[%s1412_s2 + $0x20] sm:$0xff]  ;;  %v1088_v53 = vld [vmem:[%s1412_s2 + $0x10] sm:$0xff]  ;;  %v904_v58 = vld [vmem:[%s1410_s0 + $0x54] sm:$0xf0]  ;;  %s998_s10 = smov 16  }
   0x9   :  { %v871_v57 = vld [vmem:[%s1410_s0 + $0x50] sm:$0xf]  ;;  %v903_v61 = vld [vmem:[%s1410_s0 + $0x54] sm:$0xf]  ;;  %v873_v62 = vld [vmem:[%s1410_s0 + $0x58] sm:$0xf0] }
   0xa   :  { %55 = vperm.xlu0 %910, %v27_v12   ;;  %v34_v0 = vld [vmem:[%s1412_s2 + $0x60] sm:$0xff]  ;;  %v872_v2 = vor.u32 %v904_v58, %v871_v57  ;;  %v876_v6 = vor.u32 %v903_v61, %v873_v62  ;;  %v902_v8 = vld [vmem:[%s1410_s0 + $0x44] sm:$0xf0] }
   0xb   :  { %134 = vperm.xlu1 %911, %v27_v12   ;;  %v35_v10 = vpack.c.bf16 %v34_v0, %v1082_v22  ;;  %v865_v12 = vld [vmem:[%s1410_s0 + $0x48] sm:$0xf0] }
   0xc   :  { %45 = vperm.xlu2 %912, %v25_v9  }
  0x12   :  { %913 = vset.pattern.permute.xlu0 %v995_v11 }
  0x13   :  { %122 = vperm.xlu0 %913, %v24_v7   ;;  %126 = vperm.xlu1 %911, %v25_v9   ;;  %v863_v7 = vld [vmem:[%s1410_s0 + $0x40] sm:$0xf] }
  0x14   :  { %213 = vperm.xlu2 %912, %v1050_v13  }
  0x17   :  { %824 = vmatmul.msk.bf16.gmra.mxu0 %vm68_vm0, %v29_v14 }
  0x18   :  { %826 = vmatmul.msk.bf16.gmra.mxu1 %vm68_vm0, %v29_v14  ;;  %v864_v14 = vor.u32 %v902_v8, %v863_v7 }
  0x1b   :  { %721 = vperm.xlu0 %913, %v1063_v16   ;;  %914 = vset.pattern.permute.xlu1 %v994_v3 }
  0x1c   :  { %657 = vperm.xlu2 %912, %v1058_v15   ;;  %652 = vperm.xlu1 %914, %v1063_v16  }
  0x23   :  { %916 = vset.pattern.permute.xlu0 %v994_v3 }
  0x24   :  { %642 = vperm.xlu2 %912, %v1072_v17   ;;  %915 = vset.pattern.permute.xlu1 %v995_v11 }
  0x25   :  { %725 = vperm.xlu1 %915, %v1058_v15   ;;  %647 = vperm.xlu0 %916, %v1088_v53  }
  0x2c   :  { %917 = vset.pattern.permute.xlu2 %v995_v11  ;;  %v901_v11 = vld [vmem:[%s1410_s0 + $0x44] sm:$0xf] }
  0x2d   :  { %713 = vperm.xlu1 %915, %v1072_v17   ;;  %717 = vperm.xlu2 %917, %v1088_v53  }
  0x35   :  { %918 = vset.pattern.permute.xlu1 %v994_v3  ;;  %919 = vset.pattern.permute.xlu2 %v994_v3  ;;  %v847_v3 = vld [vmem:[%s1410_s0 + $0x20] sm:$0xf] }
  0x36   :  { %159 = vperm.xlu1 %918, %v1082_v22   ;;  %v857_v22 = vld [vmem:[%s1410_s0 + $0x38] sm:$0xf0]  ;;  %164 = vperm.xlu2 %919, %v34_v0  }
  0x5e   :  { %v41_v25 = vpop.permute.xlu2 %40 }
  0x66   :  { %v46_v31 = vpop.permute.xlu2 %45 }
  0x74   :  { %v51_v20 = vpop.permute.xlu0 %50 }
  0x75   :  { %v131_v21 = vpop.permute.xlu1 %130 }
  0x7c   :  { %v56_v26 = vpop.permute.xlu0 %55 }
  0x7d   :  { %v135_v27 = vpop.permute.xlu1 %134 }
  0x84   :  { %v84_v18 = vpop.f32.mrf.mxu0 }
  0x85   :  { %v103_v19 = vpop.f32.mrf.mxu1  ;;  %v85_v32 = vadd.f32 %v84_v18, %v41_v25  ;;  %v123_v34 = vpop.permute.xlu0 %122  ;;  %v868_v18 = vor.u32 %v901_v11, %v865_v12 }
  0x86   :  { %v127_v37 = vpop.permute.xlu1 %126  ;;  %v104_v39 = vadd.f32 %v103_v19, %v41_v25  ;;  %v855_v19 = vld [vmem:[%s1410_s0 + $0x30] sm:$0xf]  ;;  %v898_v25 = vld [vmem:[%s1410_s0 + $0x24] sm:$0xf0] }
  0x87   :  { %v137_v43 = vmul.f32 %v123_v34, %v85_v32  ;;  %vm113_vm7 = vcmp.ge.f32.partialorder %v85_v32, 0.0 }
  0x88   :  { %v138_v50 = vmul.f32 %v123_v34, %v104_v39  ;;  %vm114_vm8 = vcmp.ge.f32.partialorder %v104_v39, 0.0 }
  0x89   :  { %v145_v1 = vsel %vm113_vm7, %v85_v32, %v137_v43  ;;  %v895_v32 = vld [vmem:[%s1410_s0 + $0x14] sm:$0xf] }
  0x8a   :  { %v146_v5 = vsel %vm114_vm8, %v104_v39, %v138_v50  ;;  %v833_v39 = vld [vmem:[%s1410_s0 + $0x8] sm:$0xf0] }
  0x8c   :  { %v86_v23 = vpop.f32.mrf.mxu0 }
  0x8d   :  { %v105_v24 = vpop.f32.mrf.mxu1  ;;  %v87_v35 = vadd.f32 %v86_v23, %v46_v31 }
  0x8e   :  { %v106_v36 = vadd.f32 %v105_v24, %v46_v31  ;;  %v896_v31 = vld [vmem:[%s1410_s0 + $0x14] sm:$0xf0] }
  0x8f   :  { %v139_v46 = vmul.f32 %v127_v37, %v87_v35  ;;  %vm115_vm5 = vcmp.ge.f32.partialorder %v87_v35, 0.0 }
  0x90   :  { %v140_v48 = vmul.f32 %v127_v37, %v106_v36  ;;  %vm116_vm6 = vcmp.ge.f32.partialorder %v106_v36, 0.0  ;;  %v894_v37 = vld [vmem:[%s1410_s0 + $0x4] sm:$0xf0] }
  0x91   :  { %v147_v60 = vsel %vm115_vm5, %v87_v35, %v139_v46 }
  0x92   :  { %v148_v63 = vsel %vm116_vm6, %v106_v36, %v140_v48  ;;  %v153_v4 = vpack.c.bf16 %v147_v60, %v145_v1  ;;  %v831_v36 = vld [vmem:[%s1410_s0] sm:$0xf] }
  0x93   :  { %v154_v9 = vpack.c.bf16 %v148_v63, %v146_v5 }
  0x94   :  { %v89_v28 = vpop.f32.mrf.mxu0 }
  0x95   :  { %v108_v29 = vpop.f32.mrf.mxu1  ;;  %v90_v30 = vadd.f32 %v89_v28, %v51_v20  ;;  %v848_v28 = vor.u32 %v898_v25, %v847_v3 }
  0x96   :  { %v109_v33 = vadd.f32 %v108_v29, %v51_v20  ;;  %v900_v20 = vld [vmem:[%s1410_s0 + $0x34] sm:$0xf0] }
  0x97   :  { %v141_v40 = vmul.f32 %v131_v21, %v90_v30  ;;  %vm117_vm1 = vcmp.ge.f32.partialorder %v90_v30, 0.0  ;;  %v856_v23 = vor.u32 %v900_v20, %v855_v19 }
  0x98   :  { %v142_v44 = vmul.f32 %v131_v21, %v109_v33  ;;  %vm118_vm3 = vcmp.ge.f32.partialorder %v109_v33, 0.0  ;;  %v899_v21 = vld [vmem:[%s1410_s0 + $0x34] sm:$0xf] }
  0x99   :  { %v149_v51 = vsel %vm117_vm1, %v90_v30, %v141_v40  ;;  %v860_v24 = vor.u32 %v899_v21, %v857_v22  ;;  %v839_v30 = vld [vmem:[%s1410_s0 + $0x10] sm:$0xf]  ;;  %v832_v40 = vor.u32 %v894_v37, %v831_v36 }
  0x9a   :  { %v150_v55 = vsel %vm118_vm3, %v109_v33, %v142_v44  ;;  %v841_v33 = vld [vmem:[%s1410_s0 + $0x18] sm:$0xf0]  ;;  %v840_v34 = vor.u32 %v896_v31, %v839_v30 }
  0x9b   :  { %v844_v35 = vor.u32 %v895_v32, %v841_v33 }
  0x9c   :  { %v91_v38 = vpop.f32.mrf.mxu0 }
  0x9d   :  { %v92_v41 = vadd.f32 %v91_v38, %v56_v26  ;;  %v110_v42 = vpop.f32.mrf.mxu1  ;;  %v893_v38 = vld [vmem:[%s1410_s0 + $0x4] sm:$0xf] }
  0x9e   :  { %v111_v45 = vadd.f32 %v110_v42, %v56_v26  ;;  %v897_v26 = vld [vmem:[%s1410_s0 + $0x24] sm:$0xf]  ;;  %v17_v42 = vpack.c.bf16 %v1050_v13, %v1050_v13 }
  0x9f   :  { %v143_v47 = vmul.f32 %v135_v27, %v92_v41  ;;  %vm119_vm2 = vcmp.ge.f32.partialorder %v92_v41, 0.0 }
  0xa0   :  { %v144_v49 = vmul.f32 %v135_v27, %v111_v45  ;;  %vm120_vm4 = vcmp.ge.f32.partialorder %v111_v45, 0.0  ;;  %v849_v27 = vld [vmem:[%s1410_s0 + $0x28] sm:$0xf0] }
  0xa1   :  { %v151_v52 = vsel %vm119_vm2, %v92_v41, %v143_v47  ;;  %v852_v29 = vor.u32 %v897_v26, %v849_v27  ;;  %v836_v41 = vor.u32 %v893_v38, %v833_v39  ;;  %v214_v47 = vpop.permute.xlu2 %213 }
  0xa2   :  { %v155_v54 = vpack.c.bf16 %v151_v52, %v149_v51  ;;  %v152_v56 = vsel %vm120_vm4, %v111_v45, %v144_v49 }
  0xa3   :  { %v156_v59 = vpack.c.bf16 %v152_v56, %v150_v55 }
  0xa4   :  { %177 = vmatpush.bf16.msra.mxu2 %v155_v54 }
  0xa5   :  { %191 = vmatpush.bf16.msra.mxu3 %v156_v59 }
  0xa8   :  { %178 = vmatpush.bf16.msra.mxu2 %v153_v4 }
  0xa9   :  { %192 = vmatpush.bf16.msra.mxu3 %v154_v9 }
  0xab   :  { %827 = vmatmul.msk.bf16.vlgmr.msra.gmra.mxu2 %vm167_vm9, %v35_v10 }
  0xac   :  { %282 = vmatpush.bf16.msrb.mxu2 %v872_v2  ;;  %828 = vmatmul.msk.bf16.vlgmr.msra.gmra.mxu3 %vm167_vm9, %v35_v10 }
  0xad   :  { %295 = vmatpush.bf16.msrb.mxu3 %v876_v6 }
  0xb0   :  { %283 = vmatpush.bf16.msrb.mxu2 %v864_v14 }
  0xb1   :  { %296 = vmatpush.bf16.msrb.mxu3 %v868_v18 }
  0xb4   :  { %284 = vmatpush.bf16.msrb.mxu2 %v856_v23 }
  0xb5   :  { %297 = vmatpush.bf16.msrb.mxu3 %v860_v24 }
  0xb8   :  { %285 = vmatpush.bf16.msrb.mxu2 %v848_v28 }
  0xb9   :  { %298 = vmatpush.bf16.msrb.mxu3 %v852_v29 }
  0xbc   :  { %286 = vmatpush.bf16.msrb.mxu2 %v840_v34 }
  0xbd   :  { %299 = vmatpush.bf16.msrb.mxu3 %v844_v35 }
  0xc0   :  { %287 = vmatpush.bf16.msrb.mxu2 %v832_v40 }
  0xc1   :  { %300 = vmatpush.bf16.msrb.mxu3 %v836_v41 }
  0xc3   :  { %877 = vmatmul.msk.bf16.vlgmr.msrb.gmra.mxu2 %vm276_vm10, %v17_v42 }
  0xc4   :  { %878 = vmatmul.msk.bf16.vlgmr.msrb.gmra.mxu3 %vm276_vm10, %v17_v42 }
 0x12e   :  { %v1174_v43 = vpop.f32.mrf.mxu2 }
 0x12f   :  { %v1176_v44 = vpop.f32.mrf.mxu3 }
 0x136   :  { %v1178_v45 = vpop.f32.mrf.mxu2 }
 0x137   :  { %v1180_v46 = vpop.f32.mrf.mxu3 }
 0x146   :  { %v289_v48 = vpop.f32.mrf.mxu2 }
 0x147   :  { %v1182_v49 = vadd.f32 %v289_v48, %v214_v47  ;;  %v302_v50 = vpop.f32.mrf.mxu3 }
 0x148   :  { %v1184_v51 = vadd.f32 %v302_v50, %v214_v47 }
 0x149   :  { %v308_v13 = vrot.slane %v1182_v49, 3 }
 0x14a   :  { %v309_v52 = vrot.slane %v1184_v51, 3 }
 0x14b   :  { %v312_v54 = vadd.f32 %v308_v13, %v1182_v49 }
 0x14c   :  { %v313_v55 = vadd.f32 %v309_v52, %v1184_v51 }
 0x14d   :  { %v879_v56 = vmul.f32 -1.442695, %v312_v54 }
 0x14e   :  { %v880_v57 = vmul.f32 -1.442695, %v313_v55  ;;  %v291_v58 = vpop.f32.mrf.mxu2 }
 0x14f   :  { %920 = vpow2.f32 %v879_v56  ;;  %v304_v59 = vpop.f32.mrf.mxu3  ;;  %v390_v56 = vrot.slane %v1182_v49, 4 }
 0x150   :  { %922 = vpow2.f32 %v880_v57  ;;  %v391_v59 = vrot.slane %v1184_v51, 4 }
 0x155   :  { %v921_v60 = vpop.eup %920 }
 0x156   :  { %v923_v61 = vpop.eup %922  ;;  %v320_v62 = vadd.f32 1.0, %v921_v60 }
 0x157   :  { %v321_v63 = vadd.f32 1.0, %v923_v61 }
 0x158   :  { %924 = vrcp.f32 %v320_v62  ;;  %v333_v6 = vand.u32 2147483648, %v320_v62  ;;  %v331_v9 = vand.u32 2147483647, %v320_v62  ;;  %vm327_vm13 = vweird.f32 %v320_v62 }
 0x159   :  { %926 = vrcp.f32 %v321_v63  ;;  %v348_v10 = vand.u32 2147483648, %v321_v63  ;;  %v346_v12 = vand.u32 2147483647, %v321_v63  ;;  %vm342_vm15 = vweird.f32 %v321_v63 }
 0x15a   :  { %v334_v18 = vor.u32 1.1754944e-38, %v333_v6  ;;  %vm332_vm0 = vcmp.eq.f32.partialorder %v331_v9, 8.507059e+37 }
 0x15b   :  { %v349_v21 = vor.u32 1.1754944e-38, %v348_v10  ;;  %vm347_vm2 = vcmp.eq.f32.partialorder %v346_v12, 8.507059e+37 }
 0x15e   :  { %v925_v0 = vpop.eup %924 }
 0x15f   :  { %v927_v1 = vpop.eup %926  ;;  %v323_v2 = vmul.f32 %v925_v0, %v320_v62  ;;  %vm328_vm11 = vweird.f32 %v925_v0 }
 0x160   :  { %v338_v4 = vmul.f32 %v927_v1, %v321_v63  ;;  %vm343_vm12 = vweird.f32 %v927_v1  ;;  %vm329_vm14 = vmor %vm327_vm13, %vm328_vm11 }
 0x161   :  { %v324_v5 = vsub.f32 1.0, %v323_v2  ;;  %vm344_vm1 = vmor %vm342_vm15, %vm343_vm12 }
 0x162   :  { %v339_v7 = vsub.f32 1.0, %v338_v4 }
 0x163   :  { %v325_v8 = vmul.f32 %v925_v0, %v324_v5 }
 0x164   :  { %v340_v11 = vmul.f32 %v927_v1, %v339_v7 }
 0x165   :  { %v326_v14 = vadd.f32 %v925_v0, %v325_v8 }
 0x166   :  { %v341_v19 = vadd.f32 %v927_v1, %v340_v11 }
 0x167   :  { %v330_v20 = vsel %vm329_vm14, %v925_v0, %v326_v14 }
 0x168   :  { %v335_v22 = vsel %vm332_vm0, %v334_v18, %v330_v20  ;;  %v345_v23 = vsel %vm344_vm1, %v927_v1, %v341_v19 }
 0x169   :  { %v352_v24 = vmul.f32 1.442695, %v335_v22  ;;  %v350_v3 = vsel %vm347_vm2, %v349_v21, %v345_v23 }
 0x16a   :  { %v354_v25 = vmul.f32 1.442695, %v350_v3 }
 0x16b   :  { %928 = vpow2.f32 %v352_v24 }
 0x16c   :  { %930 = vpow2.f32 %v354_v25 }
 0x171   :  { %v1190_v26 = vpop.eup %928 }
 0x172   :  { %v1192_v27 = vpop.eup %930  ;;  %932 = vrcp.f32 %v1190_v26  ;;  %v369_v33 = vand.u32 2147483648, %v1190_v26  ;;  %v367_v36 = vand.u32 2147483647, %v1190_v26  ;;  %vm363_vm5 = vweird.f32 %v1190_v26 }
 0x173   :  { %934 = vrcp.f32 %v1192_v27  ;;  %v384_v37 = vand.u32 2147483648, %v1192_v27  ;;  %v382_v39 = vand.u32 2147483647, %v1192_v27  ;;  %vm378_vm7 = vweird.f32 %v1192_v27 }
 0x174   :  { %v370_v41 = vor.u32 1.1754944e-38, %v369_v33  ;;  %v1206_v47 = vmul.f32 %v1190_v26, %v1182_v49  ;;  %vm368_vm8 = vcmp.eq.f32.partialorder %v367_v36, 8.507059e+37  ;;  %v1210_v52 = vmul.f32 %v1192_v27, %v1184_v51 }
 0x175   :  { %v385_v50 = vor.u32 1.1754944e-38, %v384_v37  ;;  %vm383_vm11 = vcmp.eq.f32.partialorder %v382_v39, 8.507059e+37  ;;  %v440_v39 = vrot.slane %v1182_v49, 1 }
 0x178   :  { %v933_v28 = vpop.eup %932 }
 0x179   :  { %v935_v29 = vpop.eup %934  ;;  %v359_v30 = vmul.f32 %v933_v28, %v1190_v26  ;;  %vm364_vm3 = vweird.f32 %v933_v28 }
 0x17a   :  { %v374_v31 = vmul.f32 %v935_v29, %v1192_v27  ;;  %vm379_vm4 = vweird.f32 %v935_v29  ;;  %vm365_vm6 = vmor %vm363_vm5, %vm364_vm3 }
 0x17b   :  { %v360_v32 = vsub.f32 1.0, %v359_v30  ;;  %vm380_vm10 = vmor %vm378_vm7, %vm379_vm4 }
 0x17c   :  { %v375_v34 = vsub.f32 1.0, %v374_v31 }
 0x17d   :  { %v361_v35 = vmul.f32 %v933_v28, %v360_v32 }
 0x17e   :  { %v376_v38 = vmul.f32 %v935_v29, %v375_v34 }
 0x17f   :  { %v362_v40 = vadd.f32 %v933_v28, %v361_v35 }
 0x180   :  { %v377_v42 = vadd.f32 %v935_v29, %v376_v38 }
 0x181   :  { %v366_v48 = vsel %vm365_vm6, %v933_v28, %v362_v40 }
 0x182   :  { %v371_v13 = vsel %vm368_vm8, %v370_v41, %v366_v48  ;;  %v381_v54 = vsel %vm380_vm10, %v935_v29, %v377_v42 }
 0x183   :  { %v388_v55 = vmul.f32 %v371_v13, %v1206_v47  ;;  %v386_v57 = vsel %vm383_vm11, %v385_v50, %v381_v54  ;;  %v441_v50 = vrot.slane %v1184_v51, 1 }
 0x184   :  { %v389_v58 = vmul.f32 %v386_v57, %v1210_v52 }
 0x185   :  { %v394_v60 = vadd.f32 %v390_v56, %v388_v55 }
 0x186   :  { %v395_v61 = vadd.f32 %v391_v59, %v389_v58 }
 0x187   :  { %v881_v62 = vmul.f32 -1.442695, %v394_v60 }
 0x188   :  { %v882_v63 = vmul.f32 -1.442695, %v395_v61 }
 0x189   :  { %936 = vpow2.f32 %v881_v62 }
 0x18a   :  { %938 = vpow2.f32 %v882_v63 }
 0x18f   :  { %v937_v0 = vpop.eup %936 }
 0x190   :  { %v939_v1 = vpop.eup %938  ;;  %v402_v2 = vadd.f32 1.0, %v937_v0 }
 0x191   :  { %v403_v4 = vadd.f32 1.0, %v939_v1 }
 0x192   :  { %940 = vrcp.f32 %v402_v2  ;;  %v415_v10 = vand.u32 2147483648, %v402_v2  ;;  %v413_v14 = vand.u32 2147483647, %v402_v2  ;;  %vm409_vm14 = vweird.f32 %v402_v2 }
 0x193   :  { %942 = vrcp.f32 %v403_v4  ;;  %v430_v18 = vand.u32 2147483648, %v403_v4  ;;  %v428_v20 = vand.u32 2147483647, %v403_v4  ;;  %vm424_vm0 = vweird.f32 %v403_v4 }
 0x194   :  { %v416_v22 = vor.u32 1.1754944e-38, %v415_v10  ;;  %vm414_vm1 = vcmp.eq.f32.partialorder %v413_v14, 8.507059e+37  ;;  %v481_v10 = vrot.slane %v1184_v51, 5 }
 0x195   :  { %v431_v3 = vor.u32 1.1754944e-38, %v430_v18  ;;  %vm429_vm3 = vcmp.eq.f32.partialorder %v428_v20, 8.507059e+37 }
 0x198   :  { %v941_v5 = vpop.eup %940 }
 0x199   :  { %v943_v6 = vpop.eup %942  ;;  %v405_v7 = vmul.f32 %v941_v5, %v402_v2  ;;  %vm410_vm12 = vweird.f32 %v941_v5 }
 0x19a   :  { %v420_v8 = vmul.f32 %v943_v6, %v403_v4  ;;  %vm425_vm13 = vweird.f32 %v943_v6  ;;  %vm411_vm15 = vmor %vm409_vm14, %vm410_vm12 }
 0x19b   :  { %v406_v9 = vsub.f32 1.0, %v405_v7  ;;  %vm426_vm2 = vmor %vm424_vm0, %vm425_vm13  ;;  %v480_v7 = vrot.slane %v1182_v49, 5 }
 0x19c   :  { %v421_v11 = vsub.f32 1.0, %v420_v8 }
 0x19d   :  { %v407_v12 = vmul.f32 %v941_v5, %v406_v9 }
 0x19e   :  { %v422_v19 = vmul.f32 %v943_v6, %v421_v11 }
 0x19f   :  { %v408_v21 = vadd.f32 %v941_v5, %v407_v12 }
 0x1a0   :  { %v423_v23 = vadd.f32 %v943_v6, %v422_v19 }
 0x1a1   :  { %v412_v24 = vsel %vm411_vm15, %v941_v5, %v408_v21 }
 0x1a2   :  { %v417_v25 = vsel %vm414_vm1, %v416_v22, %v412_v24  ;;  %v427_v28 = vsel %vm426_vm2, %v943_v6, %v423_v23 }
 0x1a3   :  { %v434_v29 = vmul.f32 1.442695, %v417_v25  ;;  %v432_v30 = vsel %vm429_vm3, %v431_v3, %v427_v28 }
 0x1a4   :  { %v436_v31 = vmul.f32 1.442695, %v432_v30 }
 0x1a5   :  { %944 = vpow2.f32 %v434_v29 }
 0x1a6   :  { %946 = vpow2.f32 %v436_v31 }
 0x1ab   :  { %v1216_v32 = vpop.eup %944 }
 0x1ac   :  { %v1218_v33 = vpop.eup %946  ;;  %v1222_v34 = vadd.f32 %v1216_v32, %v1190_v26  ;;  %v444_v42 = vmul.f32 %v1216_v32, %v440_v39 }
 0x1ad   :  { %v1226_v35 = vadd.f32 %v1218_v33, %v1192_v27  ;;  %v445_v57 = vmul.f32 %v1218_v33, %v441_v50 }
 0x1ae   :  { %948 = vrcp.f32 %v1222_v34  ;;  %v459_v48 = vand.u32 2147483648, %v1222_v34  ;;  %v457_v55 = vand.u32 2147483647, %v1222_v34  ;;  %vm453_vm6 = vweird.f32 %v1222_v34 }
 0x1af   :  { %950 = vrcp.f32 %v1226_v35  ;;  %v474_v56 = vand.u32 2147483648, %v1226_v35  ;;  %v472_v59 = vand.u32 2147483647, %v1226_v35  ;;  %vm468_vm8 = vweird.f32 %v1226_v35 }
 0x1b0   :  { %v460_v61 = vor.u32 1.1754944e-38, %v459_v48  ;;  %v446_v63 = vadd.f32 %v444_v42, %v1206_v47  ;;  %vm458_vm10 = vcmp.eq.f32.partialorder %v457_v55, 8.507059e+37  ;;  %v447_v4 = vadd.f32 %v445_v57, %v1210_v52 }
 0x1b1   :  { %v475_v1 = vor.u32 1.1754944e-38, %v474_v56  ;;  %vm473_vm12 = vcmp.eq.f32.partialorder %v472_v59, 8.507059e+37  ;;  %v1265_v59 = vld [vmem:[%s1410_s0 + $0x18] sm:$0xff] }
 0x1b4   :  { %v949_v36 = vpop.eup %948 }
 0x1b5   :  { %v951_v37 = vpop.eup %950  ;;  %v449_v38 = vmul.f32 %v949_v36, %v1222_v34  ;;  %vm454_vm4 = vweird.f32 %v949_v36 }
 0x1b6   :  { %v464_v40 = vmul.f32 %v951_v37, %v1226_v35  ;;  %vm469_vm5 = vweird.f32 %v951_v37  ;;  %vm455_vm7 = vmor %vm453_vm6, %vm454_vm4 }
 0x1b7   :  { %v450_v41 = vsub.f32 1.0, %v449_v38  ;;  %vm470_vm11 = vmor %vm468_vm8, %vm469_vm5 }
 0x1b8   :  { %v465_v13 = vsub.f32 1.0, %v464_v40 }
 0x1b9   :  { %v451_v54 = vmul.f32 %v949_v36, %v450_v41 }
 0x1ba   :  { %v466_v58 = vmul.f32 %v951_v37, %v465_v13 }
 0x1bb   :  { %v452_v60 = vadd.f32 %v949_v36, %v451_v54 }
 0x1bc   :  { %v467_v62 = vadd.f32 %v951_v37, %v466_v58  ;;  %v1259_v58 = vld [vmem:[%s1410_s0 + $0x10] sm:$0xff] }
 0x1bd   :  { %v456_v0 = vsel %vm455_vm7, %v949_v36, %v452_v60  ;;  %v1280_v60 = vld [vmem:[%s1410_s0 + $0x50] sm:$0xff] }
 0x1be   :  { %v461_v2 = vsel %vm458_vm10, %v460_v61, %v456_v0  ;;  %v471_v5 = vsel %vm470_vm11, %v951_v37, %v467_v62  ;;  %v1285_v61 = vld [vmem:[%s1410_s0 + $0x58] sm:$0xff] }
 0x1bf   :  { %v478_v6 = vmul.f32 %v461_v2, %v446_v63  ;;  %v476_v8 = vsel %vm473_vm12, %v475_v1, %v471_v5  ;;  %v566_v63 = vunpack.c.l.bf16 %v1259_v58  ;;  %v568_v1 = vunpack.c.l.bf16 %v1265_v59  ;;  %v1294_v5 = vld [vmem:[%s1410_s0] sm:$0xff] }
 0x1c0   :  { %v479_v9 = vmul.f32 %v476_v8, %v447_v4  ;;  %v567_v8 = vunpack.c.h.bf16 %v1259_v58 }
 0x1c1   :  { %v484_v11 = vadd.f32 %v480_v7, %v478_v6  ;;  %v614_v6 = vunpack.c.l.bf16 %v1280_v60  ;;  %v616_v7 = vunpack.c.l.bf16 %v1285_v61 }
 0x1c2   :  { %v485_v12 = vadd.f32 %v481_v10, %v479_v9  ;;  %v569_v9 = vunpack.c.h.bf16 %v1265_v59  ;;  %v1303_v10 = vld [vmem:[%s1410_s0 + $0x8] sm:$0xff]  ;;  %v31_v59 = vld [vmem:[%s1412_s2 + $0x50] sm:$0xff] }
 0x1c3   :  { %v883_v14 = vmul.f32 -1.442695, %v484_v11  ;;  %755 = vperm.xlu1 %918, %v31_v59  }
 0x1c4   :  { %v884_v47 = vmul.f32 -1.442695, %v485_v12 }
 0x1c5   :  { %952 = vpow2.f32 %v883_v14 }
 0x1c6   :  { %954 = vpow2.f32 %v884_v47 }
 0x1cb   :  { %v953_v18 = vpop.eup %952 }
 0x1cc   :  { %v955_v19 = vpop.eup %954  ;;  %v492_v20 = vadd.f32 1.0, %v953_v18  ;;  %v615_v18 = vunpack.c.h.bf16 %v1280_v60 }
 0x1cd   :  { %v493_v21 = vadd.f32 1.0, %v955_v19  ;;  %v1311_v19 = vld [vmem:[%s1410_s0 + $0x20] sm:$0xff] }
 0x1ce   :  { %956 = vrcp.f32 %v492_v20  ;;  %v505_v3 = vand.u32 2147483648, %v492_v20  ;;  %v503_v28 = vand.u32 2147483647, %v492_v20  ;;  %vm499_vm15 = vweird.f32 %v492_v20 }
 0x1cf   :  { %958 = vrcp.f32 %v493_v21  ;;  %v520_v30 = vand.u32 2147483648, %v493_v21  ;;  %v518_v36 = vand.u32 2147483647, %v493_v21  ;;  %vm514_vm1 = vweird.f32 %v493_v21 }
 0x1d0   :  { %v506_v37 = vor.u32 1.1754944e-38, %v505_v3  ;;  %vm504_vm2 = vcmp.eq.f32.partialorder %v503_v28, 8.507059e+37 }
 0x1d1   :  { %v521_v42 = vor.u32 1.1754944e-38, %v520_v30  ;;  %vm519_vm4 = vcmp.eq.f32.partialorder %v518_v36, 8.507059e+37 }
 0x1d4   :  { %v957_v52 = vpop.eup %956 }
 0x1d5   :  { %v959_v22 = vpop.eup %958  ;;  %v495_v23 = vmul.f32 %v957_v52, %v492_v20  ;;  %vm500_vm13 = vweird.f32 %v957_v52  ;;  %v1316_v20 = vld [vmem:[%s1410_s0 + $0x28] sm:$0xff] }
 0x1d6   :  { %v510_v49 = vmul.f32 %v959_v22, %v493_v21  ;;  %vm515_vm14 = vweird.f32 %v959_v22  ;;  %vm501_vm0 = vmor %vm499_vm15, %vm500_vm13  ;;  %v1321_v21 = vld [vmem:[%s1410_s0 + $0x40] sm:$0xff]  ;;  %v584_v30 = vunpack.c.l.bf16 %v1316_v20 }
 0x1d7   :  { %v496_v24 = vsub.f32 1.0, %v495_v23  ;;  %vm516_vm3 = vmor %vm514_vm1, %vm515_vm14  ;;  %v617_v23 = vunpack.c.h.bf16 %v1285_v61 }
 0x1d8   :  { %v511_v25 = vsub.f32 1.0, %v510_v49  ;;  %v1328_v49 = vld [vmem:[%s1410_s0 + $0x48] sm:$0xff] }
 0x1d9   :  { %v497_v51 = vmul.f32 %v957_v52, %v496_v24  ;;  %v562_v24 = vunpack.c.l.bf16 %v1294_v5 }
 0x1da   :  { %v512_v29 = vmul.f32 %v959_v22, %v511_v25 }
 0x1db   :  { %v498_v31 = vadd.f32 %v957_v52, %v497_v51  ;;  %v564_v51 = vunpack.c.l.bf16 %v1303_v10 }
 0x1dc   :  { %v513_v38 = vadd.f32 %v959_v22, %v512_v29  ;;  %v582_v29 = vunpack.c.l.bf16 %v1311_v19 }
 0x1dd   :  { %v502_v39 = vsel %vm501_vm0, %v957_v52, %v498_v31  ;;  %v610_v31 = vunpack.c.l.bf16 %v1321_v21 }
 0x1de   :  { %v507_v40 = vsel %vm504_vm2, %v506_v37, %v502_v39  ;;  %v517_v41 = vsel %vm516_vm3, %v959_v22, %v513_v38  ;;  %v612_v38 = vunpack.c.l.bf16 %v1328_v49 }
 0x1df   :  { %v524_v48 = vmul.f32 1.442695, %v507_v40  ;;  %v522_v50 = vsel %vm519_vm4, %v521_v42, %v517_v41 }
 0x1e0   :  { %v526_v13 = vmul.f32 1.442695, %v522_v50  ;;  %v565_v50 = vunpack.c.h.bf16 %v1303_v10 }
 0x1e1   :  { %960 = vpow2.f32 %v524_v48  ;;  %v563_v48 = vunpack.c.h.bf16 %v1294_v5  ;;  %v585_v5 = vunpack.c.h.bf16 %v1316_v20 }
 0x1e2   :  { %962 = vpow2.f32 %v526_v13 }
 0x1e7   :  { %v1246_v54 = vpop.eup %960 }
 0x1e8   :  { %v528_v55 = vadd.f32 %v1246_v54, %v1222_v34  ;;  %v1250_v56 = vpop.eup %962  ;;  %v1270_v34 = vld [vmem:[%s1410_s0 + $0x30] sm:$0xff] }
 0x1e9   :  { %v1254_v57 = vadd.f32 %v1250_v56, %v1226_v35  ;;  %v1275_v35 = vld [vmem:[%s1410_s0 + $0x38] sm:$0xff]  ;;  %v586_v2 = vunpack.c.l.bf16 %v1270_v34  ;;  %v587_v14 = vunpack.c.h.bf16 %v1270_v34 }
 0x1ea   :  { %964 = vrcp.f32 %v528_v55  ;;  %v588_v4 = vunpack.c.l.bf16 %v1275_v35  ;;  %v589_v47 = vunpack.c.h.bf16 %v1275_v35  ;;  %v541_v52 = vand.u32 2147483648, %v528_v55 }
 0x1eb   :  { %966 = vrcp.f32 %v1254_v57  ;;  %v539_v25 = vand.u32 2147483647, %v528_v55  ;;  %vm535_vm6 = vweird.f32 %v528_v55  ;;  %v556_v37 = vand.u32 2147483648, %v1254_v57 }
 0x1ec   :  { %v542_v39 = vor.u32 1.1754944e-38, %v541_v52  ;;  %v554_v41 = vand.u32 2147483647, %v1254_v57  ;;  %vm550_vm11 = vweird.f32 %v1254_v57 }
 0x1ed   :  { %vm540_vm10 = vcmp.eq.f32.partialorder %v539_v25, 8.507059e+37  ;;  %v611_v25 = vunpack.c.h.bf16 %v1321_v21 }
 0x1ee   :  { %vm555_vm13 = vcmp.eq.f32.partialorder %v554_v41, 8.507059e+37 }
 0x1f0   :  { %v965_v62 = vpop.eup %964 }
 0x1f1   :  { %v531_v0 = vmul.f32 %v965_v62, %v528_v55  ;;  %v967_v11 = vpop.eup %966  ;;  %vm536_vm5 = vweird.f32 %v965_v62  ;;  %v583_v55 = vunpack.c.h.bf16 %v1311_v19 }
 0x1f2   :  { %v546_v22 = vmul.f32 %v967_v11, %v1254_v57  ;;  %vm537_vm7 = vmor %vm535_vm6, %vm536_vm5  ;;  %vm551_vm8 = vweird.f32 %v967_v11 }
 0x1f3   :  { %v532_v12 = vsub.f32 1.0, %v531_v0  ;;  %vm552_vm12 = vmor %vm550_vm11, %vm551_vm8 }
 0x1f4   :  { %v547_v28 = vsub.f32 1.0, %v546_v22 }
 0x1f5   :  { %v533_v3 = vmul.f32 %v965_v62, %v532_v12 }
 0x1f6   :  { %v548_v40 = vmul.f32 %v967_v11, %v547_v28 }
 0x1f7   :  { %v534_v36 = vadd.f32 %v965_v62, %v533_v3  ;;  %v557_v3 = vor.u32 1.1754944e-38, %v556_v37 }
 0x1f8   :  { %v549_v0 = vadd.f32 %v967_v11, %v548_v40 }
 0x1f9   :  { %v538_v42 = vsel %vm537_vm7, %v965_v62, %v534_v36 }
 0x1fa   :  { %v543_v13 = vsel %vm540_vm10, %v542_v39, %v538_v42  ;;  %v553_v62 = vsel %vm552_vm12, %v967_v11, %v549_v0 }
 0x1fb   :  { %v560_v12 = vmul.f32 %v1190_v26, %v543_v13  ;;  %v580_v52 = vmul.f32 %v1216_v32, %v543_v13  ;;  %v608_v22 = vmul.f32 %v1246_v54, %v543_v13  ;;  %v558_v57 = vsel %vm555_vm13, %v557_v3, %v553_v62 }
 0x1fc   :  { %v561_v40 = vmul.f32 %v1192_v27, %v558_v57  ;;  %v581_v26 = vmul.f32 %v1218_v33, %v558_v57  ;;  %v609_v32 = vmul.f32 %v1250_v56, %v558_v57  ;;  %v613_v54 = vunpack.c.h.bf16 %v1328_v49 }
 0x1fd   :  { %v570_v28 = vperm.slane %v560_v12, 0  ;;  %v590_v36 = vperm.slane %v580_v52, 0  ;;  %v618_v39 = vperm.slane %v608_v22, 0 }
 0x1fe   :  { %v571_v56 = vperm.slane %v561_v40, 0  ;;  %v591_v49 = vperm.slane %v581_v26, 0 }
 0x1ff   :  { %v576_v11 = vmul.f32 %v570_v28, %v566_v63  ;;  %v578_v37 = vmul.f32 %v570_v28, %v568_v1  ;;  %v596_v41 = vmul.f32 %v590_v36, %v586_v2  ;;  %v598_v42 = vmul.f32 %v590_v36, %v588_v4 }
 0x200   :  { %v624_v27 = vmul.f32 %v618_v39, %v614_v6  ;;  %v626_v33 = vmul.f32 %v618_v39, %v616_v7  ;;  %v619_v63 = vperm.slane %v609_v32, 0  ;;  %v572_v12 = vmul.f32 %v570_v28, %v562_v24  ;;  %v30_v7 = vld [vmem:[%s1412_s2 + $0x48] sm:$0xff]  ;;  %s996_s2 = smov [#allocation2]  }
 0x201   :  { %v604_v13 = vadd.f32 %v596_v41, %v576_v11  ;;  %v606_v0 = vadd.f32 %v598_v42, %v578_v37  ;;  %v577_v1 = vmul.f32 %v571_v56, %v567_v8  ;;  %v579_v2 = vmul.f32 %v571_v56, %v569_v9  ;;  %750 = vperm.xlu0 %916, %v30_v7   ;;  %s801_s5 = sshll.u32 %s996_s2, 4  ;;  %s802_s5 = int_to_ptr.vmem [resolvable:$true] %s801_s5 }
 0x202   :  { %v597_v4 = vmul.f32 %v591_v49, %v587_v14  ;;  %v599_v6 = vmul.f32 %v591_v49, %v589_v47  ;;  %v625_v24 = vmul.f32 %v619_v63, %v615_v18  ;;  %v627_v58 = vmul.f32 %v619_v63, %v617_v23 }
 0x203   :  { %v632_v52 = vadd.f32 %v624_v27, %v604_v13  ;;  %v634_v22 = vadd.f32 %v626_v33, %v606_v0  ;;  %v574_v8 = vmul.f32 %v570_v28, %v564_v51  ;;  %v592_v9 = vmul.f32 %v590_v36, %v582_v29 }
 0x204   :  { %v605_v34 = vadd.f32 %v597_v4, %v577_v1  ;;  %v607_v35 = vadd.f32 %v599_v6, %v579_v2  ;;  %v594_v60 = vmul.f32 %v590_v36, %v584_v30  ;;  %v620_v61 = vmul.f32 %v618_v39, %v610_v31 }
 0x205   :  { %v638_v14 = vpack.c.bf16 %v634_v22, %v632_v52  ;;  %v622_v47 = vmul.f32 %v618_v39, %v612_v38  ;;  %v600_v3 = vadd.f32 %v592_v9, %v572_v12  ;;  %v573_v62 = vmul.f32 %v571_v56, %v563_v48  ;;  %v658_v39 = vpop.permute.xlu2 %657 }
 0x206   :  { %v633_v18 = vadd.f32 %v625_v24, %v605_v34  ;;  %v635_v23 = vadd.f32 %v627_v58, %v607_v35  ;;  %v602_v57 = vadd.f32 %v594_v60, %v574_v8  ;;  %v575_v10 = vmul.f32 %v571_v56, %v565_v50 }
 0x207   :  { %672 = vmatpush.bf16.msrb.mxu0 %v638_v14  ;;  %v593_v51 = vmul.f32 %v591_v49, %v583_v55  ;;  %v595_v28 = vmul.f32 %v591_v49, %v585_v5  ;;  %v628_v29 = vadd.f32 %v620_v61, %v600_v3  ;;  %v621_v40 = vmul.f32 %v619_v63, %v611_v25 }
 0x208   :  { %v639_v19 = vpack.c.bf16 %v635_v23, %v633_v18  ;;  %v623_v26 = vmul.f32 %v619_v63, %v613_v54  ;;  %v630_v32 = vadd.f32 %v622_v47, %v602_v57  ;;  %v1389_v36 = vpack.c.bf16 %v31_v59, %v30_v7  ;;  %v653_v54 = vpop.permute.xlu1 %652 }
 0x209   :  { %v601_v20 = vadd.f32 %v593_v51, %v573_v62  ;;  %v603_v30 = vadd.f32 %v595_v28, %v575_v10  ;;  %v22_v48 = vpack.c.bf16 %v1088_v53, %v1072_v17  ;;  %v23_v55 = vpack.c.bf16 %v1058_v15, %v1063_v16  ;;  %v722_v53 = vpop.permute.xlu0 %721 }
 0x20a   :  { %691 = vmatpush.bf16.msrb.mxu1 %v639_v19  ;;  %v636_v21 = vpack.c.bf16 %v630_v32, %v628_v29 }
 0x20b   :  { %v629_v31 = vadd.f32 %v621_v40, %v601_v20  ;;  %v631_v38 = vadd.f32 %v623_v26, %v603_v30 }
 0x20c   :  { %673 = vmatpush.bf16.msrb.mxu0 %v636_v21 }
 0x20d   :  { %v637_v50 = vpack.c.bf16 %v631_v38, %v629_v31  ;;  %v643_v41 = vpop.permute.xlu2 %642 }
 0x20f   :  { %692 = vmatpush.bf16.msrb.mxu1 %v637_v50  ;;  %885 = vmatmul.msk.bf16.vlgmr.msrb.gmra.mxu0 %vm167_vm9, %v22_v48 }
 0x210   :  { %v726_v42 = vpop.permute.xlu1 %725 }
 0x211   :  { %v648_v33 = vpop.permute.xlu0 %647 }
 0x212   :  { %887 = vmatmul.msk.bf16.vlgmr.msrb.gmra.mxu1 %vm167_vm9, %v22_v48 }
 0x215   :  { %v718_v63 = vpop.permute.xlu2 %717 }
 0x218   :  { %v714_v7 = vpop.permute.xlu1 %713 }
 0x21d   :  { %v165_v31 = vpop.permute.xlu2 %164 }
 0x21e   :  { %v183_v50 = vadd.f32 %v1178_v45, %v165_v31 }
 0x21f   :  { %886 = vmatmul.msk.bf16.gmra.mxu0 %vm167_vm9, %v23_v55 }
 0x220   :  { %v160_v51 = vpop.permute.xlu1 %159 }
 0x221   :  { %v181_v29 = vadd.f32 %v1174_v43, %v160_v51  ;;  %v195_v32 = vadd.f32 %v1176_v44, %v160_v51  ;;  %v197_v44 = vadd.f32 %v1180_v46, %v165_v31 }
 0x222   :  { %888 = vmatmul.msk.bf16.gmra.mxu1 %vm167_vm9, %v23_v55 }
 0x235   :  { %v756_v38 = vpop.permute.xlu1 %755 }
 0x273   :  { %v751_v28 = vpop.permute.xlu0 %750 }
 0x28c   :  { %v675_v5 = vpop.f32.mrf.mxu0 }
 0x28d   :  { %v676_v15 = vadd.f32 %v675_v5, %v643_v41 }
 0x28f   :  { %v694_v25 = vpop.f32.mrf.mxu1  ;;  %v728_v58 = vmul.f32 %v714_v7, %v676_v15  ;;  %vm704_vm3 = vcmp.ge.f32.partialorder %v676_v15, 0.0 }
 0x290   :  { %v695_v2 = vadd.f32 %v694_v25, %v643_v41 }
 0x291   :  { %v736_v23 = vsel %vm704_vm3, %v676_v15, %v728_v58 }
 0x292   :  { %v729_v14 = vmul.f32 %v714_v7, %v695_v2  ;;  %vm705_vm5 = vcmp.ge.f32.partialorder %v695_v2, 0.0 }
 0x294   :  { %v677_v11 = vpop.f32.mrf.mxu0  ;;  %v737_v57 = vsel %vm705_vm5, %v695_v2, %v729_v14 }
 0x295   :  { %v678_v49 = vadd.f32 %v677_v11, %v648_v33 }
 0x297   :  { %v696_v17 = vpop.f32.mrf.mxu1  ;;  %v730_v4 = vmul.f32 %v718_v63, %v678_v49  ;;  %vm706_vm0 = vcmp.ge.f32.partialorder %v678_v49, 0.0 }
 0x298   :  { %v697_v16 = vadd.f32 %v696_v17, %v648_v33 }
 0x299   :  { %v738_v47 = vsel %vm706_vm0, %v678_v49, %v730_v4 }
 0x29a   :  { %v731_v59 = vmul.f32 %v718_v63, %v697_v16  ;;  %vm707_vm4 = vcmp.ge.f32.partialorder %v697_v16, 0.0  ;;  %v744_v62 = vpack.c.bf16 %v738_v47, %v736_v23 }
 0x29c   :  { %v680_v37 = vpop.f32.mrf.mxu0  ;;  %v739_v3 = vsel %vm707_vm4, %v697_v16, %v731_v59 }
 0x29d   :  { %v681_v56 = vadd.f32 %v680_v37, %v653_v54  ;;  %v745_v10 = vpack.c.bf16 %v739_v3, %v737_v57 }
 0x29f   :  { %v699_v27 = vpop.f32.mrf.mxu1  ;;  %v732_v12 = vmul.f32 %v722_v53, %v681_v56  ;;  %vm708_vm14 = vcmp.ge.f32.partialorder %v681_v56, 0.0 }
 0x2a0   :  { %v700_v13 = vadd.f32 %v699_v27, %v653_v54 }
 0x2a1   :  { %v740_v34 = vsel %vm708_vm14, %v681_v56, %v732_v12 }
 0x2a2   :  { %v733_v52 = vmul.f32 %v722_v53, %v700_v13  ;;  %vm709_vm1 = vcmp.ge.f32.partialorder %v700_v13, 0.0 }
 0x2a4   :  { %v682_v0 = vpop.f32.mrf.mxu0  ;;  %v741_v60 = vsel %vm709_vm1, %v700_v13, %v733_v52 }
 0x2a5   :  { %v683_v1 = vadd.f32 %v682_v0, %v658_v39 }
 0x2a7   :  { %v701_v6 = vpop.f32.mrf.mxu1  ;;  %vm710_vm15 = vcmp.ge.f32.partialorder %v683_v1, 0.0  ;;  %v734_v22 = vmul.f32 %v726_v42, %v683_v1 }
 0x2a8   :  { %v702_v24 = vadd.f32 %v701_v6, %v658_v39 }
 0x2a9   :  { %v742_v35 = vsel %vm710_vm15, %v683_v1, %v734_v22 }
 0x2aa   :  { %vm711_vm2 = vcmp.ge.f32.partialorder %v702_v24, 0.0  ;;  %v735_v8 = vmul.f32 %v726_v42, %v702_v24  ;;  %v746_v9 = vpack.c.bf16 %v742_v35, %v740_v34 }
 0x2ac   :  { %v743_v61 = vsel %vm711_vm2, %v702_v24, %v735_v8  ;;  %767 = vmatpush.bf16.msra.mxu2 %v746_v9 }
 0x2ad   :  { %v747_v18 = vpack.c.bf16 %v743_v61, %v741_v60 }
 0x2af   :  { %781 = vmatpush.bf16.msra.mxu3 %v747_v18 }
 0x2b0   :  { %768 = vmatpush.bf16.msra.mxu2 %v744_v62 }
 0x2b3   :  { %782 = vmatpush.bf16.msra.mxu3 %v745_v10  ;;  %889 = vmatmul.msk.bf16.vlgmr.msra.gmra.mxu2 %vm167_vm9, %v1389_v36 }
 0x2b6   :  { %890 = vmatmul.msk.bf16.vlgmr.msra.gmra.mxu3 %vm167_vm9, %v1389_v36 }
 0x336   :  { %v770_v19 = vpop.f32.mrf.mxu2 }
 0x337   :  { %v771_v40 = vadd.f32 %v770_v19, %v751_v28 }
 0x339   :  { %v784_v26 = vpop.f32.mrf.mxu3  ;;  %v789_v20 = vadd.f32 %v771_v40, %v181_v29 }
 0x33a   :  { %v785_v30 = vadd.f32 %v784_v26, %v751_v28 }
 0x33b   :  { %793 = vst [vmem:[#allocation2] sm:$0xff] %v789_v20 }
 0x33c   :  { %v790_v21 = vadd.f32 %v785_v30, %v195_v32 }
 0x33e   :  { %794 = vst [vmem:[#allocation2 + $0x8] sm:$0xff] %v790_v21  ;;  %v772_v48 = vpop.f32.mrf.mxu2 }
 0x33f   :  { %v773_v36 = vadd.f32 %v772_v48, %v756_v38 }
 0x341   :  { %v786_v43 = vpop.f32.mrf.mxu3  ;;  %v791_v55 = vadd.f32 %v773_v36, %v183_v50 }
 0x342   :  { %v787_v5 = vadd.f32 %v786_v43, %v756_v38 }
 0x343   :  { %795 = vst [vmem:[#allocation2 + $0x10] sm:$0xff] %v791_v55 }
 0x344   :  { %v792_v25 = vadd.f32 %v787_v5, %v197_v44 }
 0x346   :  { %796 = vst [vmem:[#allocation2 + $0x18] sm:$0xff] %v792_v25 }
 0x347   :  { %809 = dma.vmem_to_hbm [thread:$0]  %s802_s5, 512, %s804_s8, [#allocation3], %s997_s9, %s997_s9, %s998_s10  }
 0x348   :  { %992 = dma.done.wait [#allocation3], 512  }
 0x349   :  { %993 = vsyncadd [#allocation3], 4294966784 }
 0x34a   :  { %814 = vsyncpa [#allocation3], 1 }

</bundles_post_ra>
